<compile_context>
chip_gen: v7x
topology: tpu7x:2x2x1
jax: 0.10.0
libtpu: 0.0.40
codegen_flags: <defaults>
</compile_context>

<pallas_src>
import functools

import jax
import jax.numpy as jnp
from jax.experimental import pallas as pl
from jax.experimental.pallas import tpu as pltpu

_N_PAD = 128  # final layer output lanes padded 3 -> 128 (lane-dense stores)


def _mlp_kernel(x_ref,
                w1_ref, b1_ref,
                w2_ref, b2_ref,
                w3_ref, b3_ref,
                w4_ref, b4_ref,
                o_ref):
    """Fused 4-layer MLP on one batch tile: BN pre-folded, ReLU between layers."""
    cdt = w1_ref.dtype  # matmul input dtype (f32, or bf16 on v6e/v7x); accumulate f32
    h = jnp.dot(x_ref[...].astype(cdt), w1_ref[...],
                preferred_element_type=jnp.float32)
    h = jnp.maximum(h + b1_ref[...], 0.0)
    h = jnp.dot(h.astype(cdt), w2_ref[...], preferred_element_type=jnp.float32)
    h = jnp.maximum(h + b2_ref[...], 0.0)
    h = jnp.dot(h.astype(cdt), w3_ref[...], preferred_element_type=jnp.float32)
    h = jnp.maximum(h + b3_ref[...], 0.0)
    h = jnp.dot(h.astype(cdt), w4_ref[...], preferred_element_type=jnp.float32)
    o_ref[...] = (h + b4_ref[...]).astype(o_ref.dtype)


def _round_up(x, m):
    return (x + m - 1) // m * m


@functools.partial(jax.jit, static_argnames=("tm",))
def mlp_forward(x, params, *, tm=None):
    (w1, b1, w2, b2, w3, b3, w4, b4) = params
    B, F = x.shape
    n_out = 3

    # Batch tile: multiple of 8 sublanes. 512 keeps the (tm,512) f32 activation
    # well inside v7x's 64 MiB VMEM while amortizing the ~0.35 us grid-step
    # overhead on v5e/v6e. (Bump to 2048-4096 for very large batches on v5e/v6e.)
    if tm is None:
        tm = min(512, _round_up(B, 8))
    b_pad = _round_up(B, tm)
    if b_pad != B:
        x = jnp.pad(x, ((0, b_pad - B), (0, 0)))
    n_tiles = b_pad // tm

    weights = (w1, b1, w2, b2, w3, b3, w4, b4)
    # x / out blocks walk the batch; weights keep a constant block index so they
    # stay resident in VMEM across grid iterations.
    in_specs = [pl.BlockSpec((tm, F), lambda i: (i, 0))]
    in_specs += [pl.BlockSpec(p.shape, lambda i: (0, 0)) for p in weights]
    out_specs = pl.BlockSpec((tm, _N_PAD), lambda i: (i, 0))
    out_shape = jax.ShapeDtypeStruct((b_pad, _N_PAD), jnp.float32)

    flops = 2 * b_pad * (F * 128 + 128 * 512 + 512 * 128 + 128 * _N_PAD)
    param_bytes = sum(int(p.size) * p.dtype.itemsize for p in weights)
    bytes_accessed = 4 * b_pad * (F + _N_PAD) + param_bytes

    out = pl.pallas_call(
        _mlp_kernel,
        out_shape=out_shape,
        grid=(n_tiles,),
        in_specs=in_specs,
        out_specs=out_specs,
        compiler_params=pltpu.CompilerParams(
            dimension_semantics=("parallel",)),
        cost_estimate=pl.CostEstimate(
            flops=flops, transcendentals=0, bytes_accessed=bytes_accessed),
    )(x, *weights)
    return out[:B, :n_out]


def _xavier_uniform(key, fan_out, fan_in):
    # torch.nn.init.xavier_uniform_ on weight of shape (fan_out, fan_in)
    bound = (6.0 / (fan_in + fan_out)) ** 0.5
    return jax.random.uniform(key, (fan_out, fan_in), jnp.float32, -bound, bound)


def _linear_bias(key, fan_in, fan_out):
    # PyTorch default Linear bias init: U(-1/sqrt(fan_in), 1/sqrt(fan_in))
    bound = 1.0 / (fan_in ** 0.5)
    return jax.random.uniform(key, (fan_out,), jnp.float32, -bound, bound)


def make_params(key, n_features, param_dtype=jnp.float32):
    """Eval-mode params with BatchNorm folded into the Linear layers.

    BN1d eval (running stats: mean=0, var=1, gamma=1, beta=0, eps=1e-5) is
    folded as W' = W^T * scale, b' = b*scale + shift.  Layer-4 weight/bias are
    zero-padded from 3 -> 128 output lanes.  Pass param_dtype=jnp.bfloat16 on
    v6e/v7x for full-rate MXU matmuls (biases stay f32 for the VPU path).
    """
    dims = [(n_features, 128), (128, 512), (512, 128), (128, 3)]
    keys = jax.random.split(key, 8)
    eps = 1e-5
    params = []
    for li, (fin, fout) in enumerate(dims):
        w = _xavier_uniform(keys[2 * li], fout, fin)       # torch layout (out, in)
        b = _linear_bias(keys[2 * li + 1], fin, fout)      # (out,)
        w_t = jnp.transpose(w)                             # (in, out): y = x @ w_t + b
        if li < 3:
            gamma = jnp.ones((fout,), jnp.float32)
            beta = jnp.zeros((fout,), jnp.float32)
            mean = jnp.zeros((fout,), jnp.float32)
            var = jnp.ones((fout,), jnp.float32)
            scale = gamma / jnp.sqrt(var + eps)
            shift = beta - mean * scale
            w_t = w_t * scale[None, :]
            b = b * scale + shift
        else:
            w_t = jnp.pad(w_t, ((0, 0), (0, _N_PAD - fout)))
            b = jnp.pad(b, (0, _N_PAD - fout))
        params.append(w_t.astype(param_dtype))
        params.append(b.reshape(1, -1).astype(jnp.float32))
    return tuple(params)


def reference_forward(x, params):
    (w1, b1, w2, b2, w3, b3, w4, b4) = params
    f32 = jnp.float32
    h = jnp.maximum(x @ w1.astype(f32) + b1, 0.0)
    h = jnp.maximum(h @ w2.astype(f32) + b2, 0.0)
    h = jnp.maximum(h @ w3.astype(f32) + b3, 0.0)
    return (h @ w4.astype(f32) + b4)[:, :3]


if __name__ == "__main__":
    key = jax.random.PRNGKey(0)
    k_x, k_p = jax.random.split(key)

    n_features = 16
    batch = 8
    x = jax.random.normal(k_x, (batch, n_features), jnp.float32)
    params = make_params(k_p, n_features)  # f32; use jnp.bfloat16 on v6e/v7x

    out = jax.block_until_ready(mlp_forward(x, params))
    ref = reference_forward(x, params)

    assert out.shape == (batch, 3), out.shape
    assert jnp.allclose(out, ref, atol=1e-4, rtol=1e-4), "mismatch vs reference"
    print("KERNEL_OK")
</pallas_src>

<mosaic_0001>
module attributes {stable_mosaic.version = 11 : i64} {
  func.func @_mlp_kernel(%arg0: i32, %arg1: memref<8x16xf32, #tpu.memory_space<vmem>>, %arg2: memref<16x128xf32, #tpu.memory_space<vmem>>, %arg3: memref<1x128xf32, #tpu.memory_space<vmem>>, %arg4: memref<128x512xf32, #tpu.memory_space<vmem>>, %arg5: memref<1x512xf32, #tpu.memory_space<vmem>>, %arg6: memref<512x128xf32, #tpu.memory_space<vmem>>, %arg7: memref<1x128xf32, #tpu.memory_space<vmem>>, %arg8: memref<128x128xf32, #tpu.memory_space<vmem>>, %arg9: memref<1x128xf32, #tpu.memory_space<vmem>>, %arg10: memref<8x128xf32, #tpu.memory_space<vmem>>) attributes {dimension_semantics = [#tpu.dimension_semantics<parallel>], iteration_bounds = array<i64: 1>, scalar_prefetch = 0 : i64, scratch_operands = 0 : i64, tpu.core_type = #tpu.core_type<tc>, window_params = [{transform_indices = @transform_0, window_bounds = array<i64: 8, 16>}, {pipeline_mode = #tpu.pipeline_mode<synchronous>, transform_indices = @transform_1, window_bounds = array<i64: 16, 128>}, {pipeline_mode = #tpu.pipeline_mode<synchronous>, transform_indices = @transform_2, window_bounds = array<i64: 1, 128>}, {pipeline_mode = #tpu.pipeline_mode<synchronous>, transform_indices = @transform_3, window_bounds = array<i64: 128, 512>}, {pipeline_mode = #tpu.pipeline_mode<synchronous>, transform_indices = @transform_4, window_bounds = array<i64: 1, 512>}, {pipeline_mode = #tpu.pipeline_mode<synchronous>, transform_indices = @transform_5, window_bounds = array<i64: 512, 128>}, {pipeline_mode = #tpu.pipeline_mode<synchronous>, transform_indices = @transform_6, window_bounds = array<i64: 1, 128>}, {pipeline_mode = #tpu.pipeline_mode<synchronous>, transform_indices = @transform_7, window_bounds = array<i64: 128, 128>}, {pipeline_mode = #tpu.pipeline_mode<synchronous>, transform_indices = @transform_8, window_bounds = array<i64: 1, 128>}, {transform_indices = @transform_9, window_bounds = array<i64: 8, 128>}]} {
    %c0 = arith.constant 0 : index
    %c0_0 = arith.constant 0 : index
    %0 = vector.load %arg1[%c0, %c0_0] : memref<8x16xf32, #tpu.memory_space<vmem>>, vector<8x16xf32>
    %c0_1 = arith.constant 0 : index
    %c0_2 = arith.constant 0 : index
    %1 = vector.load %arg2[%c0_1, %c0_2] : memref<16x128xf32, #tpu.memory_space<vmem>>, vector<16x128xf32>
    %cst = arith.constant dense<0.000000e+00> : vector<8x128xf32>
    %2 = tpu.matmul %0, %1, %cst {dimension_numbers = #tpu.dot_dimension_numbers<[1], [0], [0], [1], [0, 0, 1, 1], [], []>} : vector<8x16xf32>, vector<16x128xf32>, vector<8x128xf32> -> vector<8x128xf32>
    %c0_3 = arith.constant 0 : index
    %c0_4 = arith.constant 0 : index
    %3 = vector.load %arg3[%c0_3, %c0_4] : memref<1x128xf32, #tpu.memory_space<vmem>>, vector<1x128xf32>
    %4 = vector.broadcast %3 : vector<1x128xf32> to vector<8x128xf32>
    %5 = arith.addf %2, %4 : vector<8x128xf32>
    %cst_5 = arith.constant 0.000000e+00 : f32
    %6 = vector.broadcast %cst_5 : f32 to vector<8x128xf32>
    %7 = arith.maximumf %5, %6 : vector<8x128xf32>
    %c0_6 = arith.constant 0 : index
    %c0_7 = arith.constant 0 : index
    %8 = vector.load %arg4[%c0_6, %c0_7] : memref<128x512xf32, #tpu.memory_space<vmem>>, vector<128x512xf32>
    %cst_8 = arith.constant dense<0.000000e+00> : vector<8x512xf32>
    %9 = tpu.matmul %7, %8, %cst_8 {dimension_numbers = #tpu.dot_dimension_numbers<[1], [0], [0], [1], [0, 0, 1, 1], [], []>} : vector<8x128xf32>, vector<128x512xf32>, vector<8x512xf32> -> vector<8x512xf32>
    %c0_9 = arith.constant 0 : index
    %c0_10 = arith.constant 0 : index
    %10 = vector.load %arg5[%c0_9, %c0_10] : memref<1x512xf32, #tpu.memory_space<vmem>>, vector<1x512xf32>
    %11 = vector.broadcast %10 : vector<1x512xf32> to vector<8x512xf32>
    %12 = arith.addf %9, %11 : vector<8x512xf32>
    %cst_11 = arith.constant 0.000000e+00 : f32
    %13 = vector.broadcast %cst_11 : f32 to vector<8x512xf32>
    %14 = arith.maximumf %12, %13 : vector<8x512xf32>
    %c0_12 = arith.constant 0 : index
    %c0_13 = arith.constant 0 : index
    %15 = vector.load %arg6[%c0_12, %c0_13] : memref<512x128xf32, #tpu.memory_space<vmem>>, vector<512x128xf32>
    %cst_14 = arith.constant dense<0.000000e+00> : vector<8x128xf32>
    %16 = tpu.matmul %14, %15, %cst_14 {dimension_numbers = #tpu.dot_dimension_numbers<[1], [0], [0], [1], [0, 0, 1, 1], [], []>} : vector<8x512xf32>, vector<512x128xf32>, vector<8x128xf32> -> vector<8x128xf32>
    %c0_15 = arith.constant 0 : index
    %c0_16 = arith.constant 0 : index
    %17 = vector.load %arg7[%c0_15, %c0_16] : memref<1x128xf32, #tpu.memory_space<vmem>>, vector<1x128xf32>
    %18 = vector.broadcast %17 : vector<1x128xf32> to vector<8x128xf32>
    %19 = arith.addf %16, %18 : vector<8x128xf32>
    %cst_17 = arith.constant 0.000000e+00 : f32
    %20 = vector.broadcast %cst_17 : f32 to vector<8x128xf32>
    %21 = arith.maximumf %19, %20 : vector<8x128xf32>
    %c0_18 = arith.constant 0 : index
    %c0_19 = arith.constant 0 : index
    %22 = vector.load %arg8[%c0_18, %c0_19] : memref<128x128xf32, #tpu.memory_space<vmem>>, vector<128x128xf32>
    %cst_20 = arith.constant dense<0.000000e+00> : vector<8x128xf32>
    %23 = tpu.matmul %21, %22, %cst_20 {dimension_numbers = #tpu.dot_dimension_numbers<[1], [0], [0], [1], [0, 0, 1, 1], [], []>} : vector<8x128xf32>, vector<128x128xf32>, vector<8x128xf32> -> vector<8x128xf32>
    %c0_21 = arith.constant 0 : index
    %c0_22 = arith.constant 0 : index
    %24 = vector.load %arg9[%c0_21, %c0_22] : memref<1x128xf32, #tpu.memory_space<vmem>>, vector<1x128xf32>
    %25 = vector.broadcast %24 : vector<1x128xf32> to vector<8x128xf32>
    %26 = arith.addf %23, %25 : vector<8x128xf32>
    %c0_23 = arith.constant 0 : index
    %c0_24 = arith.constant 0 : index
    %27 = vector.load %arg10[%c0_23, %c0_24] : memref<8x128xf32, #tpu.memory_space<vmem>>, vector<8x128xf32>
    tpu.vector_store %arg10[%c0_23, %c0_24], %26 {strides = array<i32>} : memref<8x128xf32, #tpu.memory_space<vmem>>, vector<8x128xf32>,
    return
  }
  func.func @transform_0(%arg0: i32) -> (i32, i32) {
    %c0_i32 = arith.constant 0 : i32
    %c0_i32_0 = arith.constant 0 : i32
    return %arg0, %c0_i32 : i32, i32
  }
  func.func @transform_1(%arg0: i32) -> (i32, i32) {
    %c0_i32 = arith.constant 0 : i32
    %c0_i32_0 = arith.constant 0 : i32
    %c0_i32_1 = arith.constant 0 : i32
    return %c0_i32, %c0_i32_0 : i32, i32
  }
  func.func @transform_2(%arg0: i32) -> (i32, i32) {
    %c0_i32 = arith.constant 0 : i32
    %c0_i32_0 = arith.constant 0 : i32
    %c0_i32_1 = arith.constant 0 : i32
    return %c0_i32, %c0_i32_0 : i32, i32
  }
  func.func @transform_3(%arg0: i32) -> (i32, i32) {
    %c0_i32 = arith.constant 0 : i32
    %c0_i32_0 = arith.constant 0 : i32
    %c0_i32_1 = arith.constant 0 : i32
    return %c0_i32, %c0_i32_0 : i32, i32
  }
  func.func @transform_4(%arg0: i32) -> (i32, i32) {
    %c0_i32 = arith.constant 0 : i32
    %c0_i32_0 = arith.constant 0 : i32
    %c0_i32_1 = arith.constant 0 : i32
    return %c0_i32, %c0_i32_0 : i32, i32
  }
  func.func @transform_5(%arg0: i32) -> (i32, i32) {
    %c0_i32 = arith.constant 0 : i32
    %c0_i32_0 = arith.constant 0 : i32
    %c0_i32_1 = arith.constant 0 : i32
    return %c0_i32, %c0_i32_0 : i32, i32
  }
  func.func @transform_6(%arg0: i32) -> (i32, i32) {
    %c0_i32 = arith.constant 0 : i32
    %c0_i32_0 = arith.constant 0 : i32
    %c0_i32_1 = arith.constant 0 : i32
    return %c0_i32, %c0_i32_0 : i32, i32
  }
  func.func @transform_7(%arg0: i32) -> (i32, i32) {
    %c0_i32 = arith.constant 0 : i32
    %c0_i32_0 = arith.constant 0 : i32
    %c0_i32_1 = arith.constant 0 : i32
    return %c0_i32, %c0_i32_0 : i32, i32
  }
  func.func @transform_8(%arg0: i32) -> (i32, i32) {
    %c0_i32 = arith.constant 0 : i32
    %c0_i32_0 = arith.constant 0 : i32
    %c0_i32_1 = arith.constant 0 : i32
    return %c0_i32, %c0_i32_0 : i32, i32
  }
  func.func @transform_9(%arg0: i32) -> (i32, i32) {
    %c0_i32 = arith.constant 0 : i32
    %c0_i32_0 = arith.constant 0 : i32
    return %arg0, %c0_i32 : i32, i32
  }
}

</mosaic_0001>

<bundles_post_ra>
// kernel: mlp_forward.1
= control target key start
LH: loop header
LB: loop body
LE: loop exit
PB: predicated region body
PF: predicated region fallthrough
CT: control target
= control target key end

     0   :  { %14 = vsyncpa [#allocation3], 0  ;;  %s1309_s0 = inlined_call_operand.hbm [shape: f32[8,16], index: 0, kind: input, shape index: {}]   ;;  %s1310_s1 = inlined_call_operand.hbm [shape: f32[16,128], index: 1, kind: input, shape index: {}]   ;;  %s1311_s2 = inlined_call_operand.vmem [shape: f32[1,128], index: 2, kind: input, shape index: {}]   ;;  %s1312_s3 = inlined_call_operand.hbm [shape: f32[128,512], index: 3, kind: input, shape index: {}]   ;;  %s1313_s4 = inlined_call_operand.vmem [shape: f32[1,512], index: 4, kind: input, shape index: {}]   ;;  %s1314_s5 = inlined_call_operand.hbm [shape: f32[512,128], index: 5, kind: input, shape index: {}]   ;;  %s1315_s6 = inlined_call_operand.vmem [shape: f32[1,128], index: 6, kind: input, shape index: {}]   ;;  %s1316_s7 = inlined_call_operand.hbm [shape: f32[128,128], index: 7, kind: input, shape index: {}]   ;;  %s1317_s8 = inlined_call_operand.vmem [shape: f32[1,128], index: 8, kind: input, shape index: {}]   ;;  %s1318_s9 = inlined_call_operand.vmem [shape: f32[8,128], index: 9, kind: output, shape index: {}]  }
   0x1   :  { %15 = vsyncpa [#allocation5], 0 }
   0x2   :  { %16 = vsyncpa [#allocation8], 0  ;;  %s1147_s30 = smov [#allocation4]   ;;  %s1031_s13 = scalar_lea.hbm %s1310_s1, 256 }
   0x3   :  { %s32_s10 = sshll.u32 %s1147_s30, 4  ;;  %p1032_p0 = scmp.ne.s32.totalorder %s1310_s1, %s1031_s13  ;;  %s33_s10 = int_to_ptr.vmem [resolvable:$true] %s32_s10 }
   0x4   :  { %p1035_p1 = scmp.lt.u32.totalorder %s1031_s13, %s1310_s1 }
   0x6   :  { %p1037_p2 = pnand %p1035_p1, %p1032_p0 }
   0x8   :  { %1040 = shalt.err (!%p1037_p2)
}
   0x9   :  { %s1041_s18 = scalar_lea.vmem %s33_s10, 256  ;;  %p1046_p4 = scmp.lt.s32.totalorder %s33_s10, %s33_s10 }
   0xa   :  { %p1042_p3 = scmp.ne.s32.totalorder %s33_s10, %s1041_s18  ;;  %p1047_p5 = scmp.lt.s32.totalorder %s1041_s18, %s1041_s18 }
   0xc   :  { %p1048_p6 = por %p1047_p5, %p1046_p4 }
   0xe   :  { %p1049_p7 = pnand %p1048_p6, %p1042_p3 }
  0x10   :  { %1052 = shalt.err (!%p1049_p7)
}
  0x11   :  { %s1148_s19 = smov 128   ;;  %s1149_s20 = smov 8  }
  0x12   :  { %38 = dma.hbm_to_vmem [thread:$0]  %s1310_s1, 256, %s33_s10, [#allocation5], %s1148_s19, %s1148_s19, %s1149_s20  }
  0x13   :  { %s1150_s23 = smov [#allocation7]   ;;  %s1151_s25 = smov [#allocation2]  }
  0x14   :  { %s60_s24 = sshll.u32 %s1150_s23, 4  ;;  %s23_s26 = sshll.u32 %s1151_s25, 4  ;;  %s61_s24 = int_to_ptr.vmem [resolvable:$true] %s60_s24  ;;  %s24_s26 = int_to_ptr.vmem [resolvable:$true] %s23_s26 }
  0x15   :  { %s1053_s29 = scalar_lea.hbm %s1314_s5, 8192 }
  0x16   :  { %p1054_p8 = scmp.ne.s32.totalorder %s1314_s5, %s1053_s29  ;;  %p1057_p9 = scmp.lt.u32.totalorder %s1053_s29, %s1314_s5 }
  0x18   :  { %p1059_p10 = pnand %p1057_p9, %p1054_p8 }
  0x1a   :  { %1062 = shalt.err (!%p1059_p10)
}
  0x1b   :  { %s1063_s1 = scalar_lea.vmem %s61_s24, 8192  ;;  %p1068_p12 = scmp.lt.s32.totalorder %s61_s24, %s61_s24 }
  0x1c   :  { %p1064_p11 = scmp.ne.s32.totalorder %s61_s24, %s1063_s1  ;;  %p1069_p13 = scmp.lt.s32.totalorder %s1063_s1, %s1063_s1 }
  0x1e   :  { %p1070_p0 = por %p1069_p13, %p1068_p12 }
  0x20   :  { %p1071_p1 = pnand %p1070_p0, %p1064_p11 }
  0x22   :  { %1074 = shalt.err (!%p1071_p1)
}
  0x23   :  { %66 = dma.hbm_to_vmem [thread:$0]  %s1314_s5, 8192, %s61_s24, [#allocation8], %s1148_s19, %s1148_s19, %s1149_s20  }
  0x24   :  { %s1075_s17 = scalar_lea.hbm %s1309_s0, 128 }
  0x25   :  { %p1076_p2 = scmp.ne.s32.totalorder %s1309_s0, %s1075_s17  ;;  %p1079_p3 = scmp.lt.u32.totalorder %s1075_s17, %s1309_s0 }
  0x27   :  { %p1081_p4 = pnand %p1079_p3, %p1076_p2 }
  0x29   :  { %1084 = shalt.err (!%p1081_p4)
}
  0x2a   :  { %s1085_s25 = scalar_lea.vmem %s24_s26, 128  ;;  %p1090_p6 = scmp.lt.s32.totalorder %s24_s26, %s24_s26 }
  0x2b   :  { %p1086_p5 = scmp.ne.s32.totalorder %s24_s26, %s1085_s25  ;;  %p1091_p7 = scmp.lt.s32.totalorder %s1085_s25, %s1085_s25 }
  0x2d   :  { %p1092_p8 = por %p1091_p7, %p1090_p6 }
  0x2f   :  { %p1093_p9 = pnand %p1092_p8, %p1086_p5 }
  0x31   :  { %1096 = shalt.err (!%p1093_p9)
}
  0x32   :  { %26 = dma.hbm_to_vmem [thread:$0]  %s1309_s0, 128, %s24_s26, [#allocation3]  }
  0x33   :  { %s1152_s27 = smov [#allocation6]   ;;  %s1097_s11 = scalar_lea.hbm %s1312_s3, 8192 }
  0x34   :  { %s46_s28 = sshll.u32 %s1152_s27, 4  ;;  %p1098_p10 = scmp.ne.s32.totalorder %s1312_s3, %s1097_s11  ;;  %s47_s28 = int_to_ptr.vmem [resolvable:$true] %s46_s28 }
  0x35   :  { %p1101_p11 = scmp.lt.u32.totalorder %s1097_s11, %s1312_s3 }
  0x37   :  { %p1103_p12 = pnand %p1101_p11, %p1098_p10 }
  0x39   :  { %1106 = shalt.err (!%p1103_p12)
}
  0x3a   :  { %s1107_s14 = scalar_lea.vmem %s47_s28, 8192  ;;  %p1112_p0 = scmp.lt.s32.totalorder %s47_s28, %s47_s28 }
  0x3b   :  { %p1108_p13 = scmp.ne.s32.totalorder %s47_s28, %s1107_s14  ;;  %p1113_p1 = scmp.lt.s32.totalorder %s1107_s14, %s1107_s14 }
  0x3d   :  { %p1114_p2 = por %p1113_p1, %p1112_p0 }
  0x3f   :  { %p1115_p3 = pnand %p1114_p2, %p1108_p13 }
  0x41   :  { %1118 = shalt.err (!%p1115_p3)
}
  0x42   :  { %s1153_s0 = smov 512   ;;  %s1154_s26 = smov 32  }
  0x43   :  { %52 = dma.hbm_to_vmem [thread:$0]  %s1312_s3, 8192, %s47_s28, [#allocation5], %s1153_s0, %s1153_s0, %s1154_s26  }
  0x44   :  { %s1155_s17 = smov [#allocation9]   ;;  %s1119_s23 = scalar_lea.hbm %s1316_s7, 2048 }
  0x45   :  { %s74_s18 = sshll.u32 %s1155_s17, 4  ;;  %p1120_p4 = scmp.ne.s32.totalorder %s1316_s7, %s1119_s23  ;;  %s75_s18 = int_to_ptr.vmem [resolvable:$true] %s74_s18 }
  0x46   :  { %p1123_p5 = scmp.lt.u32.totalorder %s1119_s23, %s1316_s7 }
  0x48   :  { %p1125_p6 = pnand %p1123_p5, %p1120_p4 }
  0x4a   :  { %1128 = shalt.err (!%p1125_p6)
}
  0x4b   :  { %s1129_s29 = scalar_lea.vmem %s75_s18, 2048  ;;  %p1134_p8 = scmp.lt.s32.totalorder %s75_s18, %s75_s18 }
  0x4c   :  { %p1130_p7 = scmp.ne.s32.totalorder %s75_s18, %s1129_s29  ;;  %p1135_p9 = scmp.lt.s32.totalorder %s1129_s29, %s1129_s29 }
  0x4e   :  { %p1136_p10 = por %p1135_p9, %p1134_p8 }
  0x50   :  { %p1137_p11 = pnand %p1136_p10, %p1130_p7 }
  0x52   :  { %1140 = shalt.err (!%p1137_p11)
}
  0x53   :  { %80 = dma.hbm_to_vmem [thread:$0]  %s1316_s7, 2048, %s75_s18, [#allocation8], %s1148_s19, %s1148_s19, %s1149_s20  }
  0x54   :  { %1141 = dma.done.wait [#allocation3], 128  }
  0x55   :  { %1142 = vsyncadd [#allocation3], 4294967168 }
  0x56   :  { %1143 = dma.done.wait [#allocation5], 8448  }
  0x57   :  { %1144 = vsyncadd [#allocation5], 4294958848 }
  0x58   :  { %1145 = dma.done.wait [#allocation8], 10240  }
  0x59   :  { %1146 = vsyncadd [#allocation8], 4294957056  ;;  %v1156_v0 = vmov 0.0|0.0   ;;  %vm1157_vm0 = vmmov 0   ;;  %v1158_v1 = vmov 0.0   ;;  %v99_v2 = vld [vmem:[#allocation4] sm:$0xff] }
  0x5a   :  { %864 = vmatprep.subr.bf16.mxu0 %v1156_v0  ;;  %826 = vmatprep.mubr.msk.f32.mxu0 %vm1157_vm0, %v1158_v1  ;;  %v100_v3 = vld [vmem:[#allocation4 + $0x8] sm:$0xff]  ;;  %v98_v5 = vld [vmem:[#allocation2] sm:$0xff]  ;;  %v183_v11 = vld [vmem:[#allocation6] sm:$0xff]  ;;  %vm108_vm1 = vcmask 130048  }
  0x5b   :  { %333 = vmatprep.mubr.f32.mxu1 %v1158_v1  ;;  %v865_v4 = vpack.c.bf16 %v100_v3, %v99_v2  ;;  %v184_v6 = vld [vmem:[#allocation6 + $0x8] sm:$0xff]  ;;  %v186_v8 = vld [vmem:[#allocation6 + $0x18] sm:$0xff]  ;;  %v187_v12 = vld [vmem:[#allocation6 + $0x20] sm:$0xff] }
  0x5c   :  { %v188_v7 = vld [vmem:[#allocation6 + $0x28] sm:$0xff]  ;;  %v190_v10 = vld [vmem:[#allocation6 + $0x38] sm:$0xff]  ;;  %v869_v14 = vpack.c.bf16 %v187_v12, %v183_v11  ;;  %v185_v15 = vld [vmem:[#allocation6 + $0x10] sm:$0xff] }
  0x5d   :  { %v867_v9 = vpack.c.bf16 %v188_v7, %v184_v6  ;;  %866 = vmatpush3.bf16.msra.mxu0 %v865_v4  ;;  %v899_v13 = vpack.c.bf16 %v190_v10, %v186_v8  ;;  %v189_v16 = vld [vmem:[#allocation6 + $0x30] sm:$0xff]  ;;  %v192_v17 = vld [vmem:[#allocation6 + $0x48] sm:$0xff]  ;;  %v194_v20 = vld [vmem:[#allocation6 + $0x58] sm:$0xff] }
  0x5e   :  { %v901_v18 = vpack.c.bf16 %v189_v16, %v185_v15  ;;  %v196_v19 = vld [vmem:[#allocation6 + $0x68] sm:$0xff]  ;;  %v198_v21 = vld [vmem:[#allocation6 + $0x78] sm:$0xff]  ;;  %v191_v24 = vld [vmem:[#allocation6 + $0x40] sm:$0xff] }
  0x5f   :  { %868 = vmatprep.subr.bf16.mxu1 %v867_v9  ;;  %900 = vmatprep.subr.bf16.mxu0 %v899_v13  ;;  %v871_v22 = vpack.c.bf16 %v196_v19, %v192_v17  ;;  %v903_v23 = vpack.c.bf16 %v198_v21, %v194_v20  ;;  %v195_v25 = vld [vmem:[#allocation6 + $0x60] sm:$0xff]  ;;  %v193_v26 = vld [vmem:[#allocation6 + $0x50] sm:$0xff]  ;;  %v200_v29 = vld [vmem:[#allocation6 + $0x88] sm:$0xff] }
  0x60   :  { %870 = vmatpush1.bf16.msra.mxu1 %v869_v14  ;;  %827 = vmatmul.mubr.msk.f32.vlgmr.msra.gmra.mrb[0].mxu0 %vm108_vm1, %v98_v5  ;;  %v873_v27 = vpack.c.bf16 %v195_v25, %v191_v24  ;;  %v197_v28 = vld [vmem:[#allocation6 + $0x70] sm:$0xff]  ;;  %v204_v30 = vld [vmem:[#allocation6 + $0xa8] sm:$0xff]  ;;  %v202_v33 = vld [vmem:[#allocation6 + $0x98] sm:$0xff] }
  0x61   :  { %902 = vmatpush1.bf16.msra.mxu0 %v901_v18  ;;  %872 = vmatprep.subr.bf16.mxu1 %v871_v22  ;;  %v905_v31 = vpack.c.bf16 %v197_v28, %v193_v26  ;;  %v875_v32 = vpack.c.bf16 %v204_v30, %v200_v29  ;;  %v206_v34 = vld [vmem:[#allocation6 + $0xb8] sm:$0xff]  ;;  %v199_v35 = vld [vmem:[#allocation6 + $0x80] sm:$0xff]  ;;  %v201_v38 = vld [vmem:[#allocation6 + $0x90] sm:$0xff] }
  0x62   :  { %904 = vmatprep.subr.bf16.mxu0 %v903_v23  ;;  %v907_v36 = vpack.c.bf16 %v206_v34, %v202_v33  ;;  %v203_v37 = vld [vmem:[#allocation6 + $0xa0] sm:$0xff]  ;;  %v205_v39 = vld [vmem:[#allocation6 + $0xb0] sm:$0xff]  ;;  %404 = vmatprep.mubr.f32.mxu0 %v1158_v1  ;;  %v208_v41 = vld [vmem:[#allocation6 + $0xc8] sm:$0xff] }
  0x63   :  { %v877_v40 = vpack.c.bf16 %v203_v37, %v199_v35  ;;  %v212_v42 = vld [vmem:[#allocation6 + $0xe8] sm:$0xff]  ;;  %v210_v43 = vld [vmem:[#allocation6 + $0xd8] sm:$0xff]  ;;  %v207_v46 = vld [vmem:[#allocation6 + $0xc0] sm:$0xff]  ;;  %v909_v48 = vpack.c.bf16 %v205_v39, %v201_v38 }
  0x64   :  { %874 = vmatpush1.bf16.msra.mxu1 %v873_v27  ;;  %v879_v44 = vpack.c.bf16 %v212_v42, %v208_v41  ;;  %v214_v45 = vld [vmem:[#allocation6 + $0xf8] sm:$0xff]  ;;  %v211_v47 = vld [vmem:[#allocation6 + $0xe0] sm:$0xff]  ;;  %v216_v49 = vld [vmem:[#allocation6 + $0x108] sm:$0xff] }
  0x65   :  { %876 = vmatprep.subr.bf16.mxu1 %v875_v32  ;;  %906 = vmatpush1.bf16.msra.mxu0 %v905_v31  ;;  %v911_v50 = vpack.c.bf16 %v214_v45, %v210_v43  ;;  %v209_v51 = vld [vmem:[#allocation6 + $0xd0] sm:$0xff]  ;;  %v220_v53 = vld [vmem:[#allocation6 + $0x128] sm:$0xff]  ;;  %v881_v54 = vpack.c.bf16 %v211_v47, %v207_v46  ;;  %v218_v55 = vld [vmem:[#allocation6 + $0x118] sm:$0xff] }
  0x66   :  { %908 = vmatprep.subr.bf16.mxu0 %v907_v36  ;;  %v213_v52 = vld [vmem:[#allocation6 + $0xf0] sm:$0xff]  ;;  %v222_v56 = vld [vmem:[#allocation6 + $0x138] sm:$0xff]  ;;  %v883_v57 = vpack.c.bf16 %v220_v53, %v216_v49  ;;  %v215_v58 = vld [vmem:[#allocation6 + $0x100] sm:$0xff] }
  0x67   :  { %v219_v59 = vld [vmem:[#allocation6 + $0x120] sm:$0xff]  ;;  %v913_v60 = vpack.c.bf16 %v213_v52, %v209_v51  ;;  %v224_v61 = vld [vmem:[#allocation6 + $0x148] sm:$0xff]  ;;  %v915_v63 = vpack.c.bf16 %v222_v56, %v218_v55  ;;  %v217_v2 = vld [vmem:[#allocation6 + $0x110] sm:$0xff] }
  0x68   :  { %878 = vmatpush1.bf16.msra.mxu1 %v877_v40  ;;  %v228_v62 = vld [vmem:[#allocation6 + $0x168] sm:$0xff]  ;;  %v221_v3 = vld [vmem:[#allocation6 + $0x130] sm:$0xff]  ;;  %v885_v4 = vpack.c.bf16 %v219_v59, %v215_v58  ;;  %v226_v5 = vld [vmem:[#allocation6 + $0x158] sm:$0xff] }
  0x69   :  { %880 = vmatprep.subr.bf16.mxu1 %v879_v44  ;;  %910 = vmatpush1.bf16.msra.mxu0 %v909_v48  ;;  %v230_v6 = vld [vmem:[#allocation6 + $0x178] sm:$0xff]  ;;  %v887_v7 = vpack.c.bf16 %v228_v62, %v224_v61  ;;  %v223_v8 = vld [vmem:[#allocation6 + $0x140] sm:$0xff]  ;;  %v917_v10 = vpack.c.bf16 %v221_v3, %v217_v2  ;;  %v232_v11 = vld [vmem:[#allocation6 + $0x188] sm:$0xff] }
  0x6a   :  { %912 = vmatprep.subr.bf16.mxu0 %v911_v50  ;;  %v227_v9 = vld [vmem:[#allocation6 + $0x160] sm:$0xff]  ;;  %v236_v12 = vld [vmem:[#allocation6 + $0x1a8] sm:$0xff]  ;;  %v919_v13 = vpack.c.bf16 %v230_v6, %v226_v5  ;;  %v225_v14 = vld [vmem:[#allocation6 + $0x150] sm:$0xff] }
  0x6b   :  { %v229_v15 = vld [vmem:[#allocation6 + $0x170] sm:$0xff]  ;;  %v889_v16 = vpack.c.bf16 %v227_v9, %v223_v8  ;;  %v234_v17 = vld [vmem:[#allocation6 + $0x198] sm:$0xff]  ;;  %v891_v19 = vpack.c.bf16 %v236_v12, %v232_v11  ;;  %v231_v20 = vld [vmem:[#allocation6 + $0x180] sm:$0xff] }
  0x6c   :  { %882 = vmatpush1.bf16.msra.mxu1 %v881_v54  ;;  %v238_v18 = vld [vmem:[#allocation6 + $0x1b8] sm:$0xff]  ;;  %v235_v21 = vld [vmem:[#allocation6 + $0x1a0] sm:$0xff]  ;;  %v921_v22 = vpack.c.bf16 %v229_v15, %v225_v14  ;;  %v233_v24 = vld [vmem:[#allocation6 + $0x190] sm:$0xff] }
  0x6d   :  { %884 = vmatprep.subr.bf16.mxu1 %v883_v57  ;;  %914 = vmatpush1.bf16.msra.mxu0 %v913_v60  ;;  %v923_v23 = vpack.c.bf16 %v238_v18, %v234_v17  ;;  %v237_v25 = vld [vmem:[#allocation6 + $0x1b0] sm:$0xff]  ;;  %v893_v26 = vpack.c.bf16 %v235_v21, %v231_v20  ;;  %v240_v28 = vld [vmem:[#allocation6 + $0x1c8] sm:$0xff]  ;;  %v242_v30 = vld [vmem:[#allocation6 + $0x1d8] sm:$0xff] }
  0x6e   :  { %916 = vmatprep.subr.bf16.mxu0 %v915_v63  ;;  %v925_v27 = vpack.c.bf16 %v237_v25, %v233_v24  ;;  %v244_v29 = vld [vmem:[#allocation6 + $0x1e8] sm:$0xff]  ;;  %v246_v32 = vld [vmem:[#allocation6 + $0x1f8] sm:$0xff]  ;;  %v239_v33 = vld [vmem:[#allocation6 + $0x1c0] sm:$0xff] }
  0x6f   :  { %v895_v31 = vpack.c.bf16 %v244_v29, %v240_v28  ;;  %v243_v34 = vld [vmem:[#allocation6 + $0x1e0] sm:$0xff]  ;;  %v927_v35 = vpack.c.bf16 %v246_v32, %v242_v30  ;;  %v241_v37 = vld [vmem:[#allocation6 + $0x1d0] sm:$0xff]  ;;  %v432_v41 = vld [vmem:[#allocation7 + $0x88] sm:$0xff] }
  0x70   :  { %886 = vmatpush1.bf16.msra.mxu1 %v885_v4  ;;  %v897_v36 = vpack.c.bf16 %v243_v34, %v239_v33  ;;  %v245_v38 = vld [vmem:[#allocation6 + $0x1f0] sm:$0xff]  ;;  %v431_v40 = vld [vmem:[#allocation7 + $0x80] sm:$0xff]  ;;  %v464_v44 = vld [vmem:[#allocation7 + $0x188] sm:$0xff] }
  0x71   :  { %888 = vmatprep.subr.bf16.mxu1 %v887_v7  ;;  %918 = vmatpush1.bf16.msra.mxu0 %v917_v10  ;;  %v929_v39 = vpack.c.bf16 %v245_v38, %v241_v37  ;;  %v463_v42 = vld [vmem:[#allocation7 + $0x180] sm:$0xff]  ;;  %v931_v43 = vpack.c.bf16 %v432_v41, %v431_v40  ;;  %v728_v46 = vld [vmem:[%s1311_s2] ss:$0 sm:$0xff]  ;;  %v433_v51 = vld [vmem:[#allocation7 + $0x90] sm:$0xff] }
  0x72   :  { %920 = vmatprep.subr.bf16.mxu0 %v919_v13  ;;  %v963_v45 = vpack.c.bf16 %v464_v44, %v463_v42  ;;  %v415_v47 = vld [vmem:[#allocation7] sm:$0xff]  ;;  %v416_v48 = vld [vmem:[#allocation7 + $0x8] sm:$0xff]  ;;  %v434_v53 = vld [vmem:[#allocation7 + $0x98] sm:$0xff] }
  0x73   :  { %v447_v49 = vld [vmem:[#allocation7 + $0x100] sm:$0xff]  ;;  %v448_v50 = vld [vmem:[#allocation7 + $0x108] sm:$0xff]  ;;  %v465_v54 = vld [vmem:[#allocation7 + $0x190] sm:$0xff]  ;;  %v933_v58 = vpack.c.bf16 %v416_v48, %v415_v47  ;;  %v935_v63 = vpack.c.bf16 %v434_v53, %v433_v51 }
  0x74   :  { %890 = vmatpush1.bf16.msra.mxu1 %v889_v16  ;;  %v466_v55 = vld [vmem:[#allocation7 + $0x198] sm:$0xff]  ;;  %v965_v59 = vpack.c.bf16 %v448_v50, %v447_v49  ;;  %v417_v60 = vld [vmem:[#allocation7 + $0x10] sm:$0xff]  ;;  %v435_v5 = vld [vmem:[#allocation7 + $0xa0] sm:$0xff] }
  0x75   :  { %892 = vmatprep.subr.bf16.mxu1 %v891_v19  ;;  %922 = vmatpush1.bf16.msra.mxu0 %v921_v22  ;;  %v418_v61 = vld [vmem:[#allocation7 + $0x18] sm:$0xff]  ;;  %v967_v2 = vpack.c.bf16 %v466_v55, %v465_v54  ;;  %v449_v3 = vld [vmem:[#allocation7 + $0x110] sm:$0xff]  ;;  %v436_v6 = vld [vmem:[#allocation7 + $0xa8] sm:$0xff] }
  0x76   :  { %924 = vmatprep.subr.bf16.mxu0 %v923_v23  ;;  %v450_v4 = vld [vmem:[#allocation7 + $0x118] sm:$0xff]  ;;  %v467_v7 = vld [vmem:[#allocation7 + $0x1a0] sm:$0xff]  ;;  %v468_v8 = vld [vmem:[#allocation7 + $0x1a8] sm:$0xff]  ;;  %v937_v9 = vpack.c.bf16 %v418_v61, %v417_v60  ;;  %v939_v13 = vpack.c.bf16 %v436_v6, %v435_v5 }
  0x77   :  { %v969_v10 = vpack.c.bf16 %v450_v4, %v449_v3  ;;  %v419_v11 = vld [vmem:[#allocation7 + $0x20] sm:$0xff]  ;;  %v420_v12 = vld [vmem:[#allocation7 + $0x28] sm:$0xff]  ;;  %v971_v14 = vpack.c.bf16 %v468_v8, %v467_v7  ;;  %v437_v17 = vld [vmem:[#allocation7 + $0xb0] sm:$0xff] }
  0x78   :  { %894 = vmatpush1.bf16.msra.mxu1 %v893_v26  ;;  %v451_v15 = vld [vmem:[#allocation7 + $0x120] sm:$0xff]  ;;  %v452_v16 = vld [vmem:[#allocation7 + $0x128] sm:$0xff]  ;;  %v438_v18 = vld [vmem:[#allocation7 + $0xb8] sm:$0xff]  ;;  %v941_v21 = vpack.c.bf16 %v420_v12, %v419_v11 }
  0x79   :  { %926 = vmatpush1.bf16.msra.mxu0 %v925_v27  ;;  %896 = vmatprep.subr.bf16.mxu1 %v895_v31  ;;  %v469_v19 = vld [vmem:[#allocation7 + $0x1b0] sm:$0xff]  ;;  %v470_v20 = vld [vmem:[#allocation7 + $0x1b8] sm:$0xff]  ;;  %v973_v22 = vpack.c.bf16 %v452_v16, %v451_v15  ;;  %v943_v25 = vpack.c.bf16 %v438_v18, %v437_v17  ;;  %v439_v29 = vld [vmem:[#allocation7 + $0xc0] sm:$0xff]  ;;  %v249_v17 = vlaneseq }
  0x7a   :  { %928 = vmatprep.subr.bf16.mxu0 %v927_v35  ;;  %v421_v23 = vld [vmem:[#allocation7 + $0x30] sm:$0xff]  ;;  %v422_v24 = vld [vmem:[#allocation7 + $0x38] sm:$0xff]  ;;  %v975_v26 = vpack.c.bf16 %v470_v20, %v469_v19  ;;  %v440_v30 = vld [vmem:[#allocation7 + $0xc8] sm:$0xff] }
  0x7b   :  { %v453_v27 = vld [vmem:[#allocation7 + $0x130] sm:$0xff]  ;;  %v454_v28 = vld [vmem:[#allocation7 + $0x138] sm:$0xff]  ;;  %v471_v31 = vld [vmem:[#allocation7 + $0x1c0] sm:$0xff]  ;;  %v945_v33 = vpack.c.bf16 %v422_v24, %v421_v23  ;;  %v947_v37 = vpack.c.bf16 %v440_v30, %v439_v29  ;;  %v250_v18 = vshrl.u32 %v249_v17, 7 }
  0x7c   :  { %898 = vmatpush1.bf16.msra.mxu1 %v897_v36  ;;  %v472_v32 = vld [vmem:[#allocation7 + $0x1c8] sm:$0xff]  ;;  %v977_v34 = vpack.c.bf16 %v454_v28, %v453_v27  ;;  %v423_v35 = vld [vmem:[#allocation7 + $0x40] sm:$0xff]  ;;  %v441_v41 = vld [vmem:[#allocation7 + $0xd0] sm:$0xff] }
  0x7d   :  { %930 = vmatpush1.bf16.msra.mxu0 %v929_v39  ;;  %932 = vmatprep.subr.bf16.mxu1 %v931_v43  ;;  %v424_v36 = vld [vmem:[#allocation7 + $0x48] sm:$0xff]  ;;  %v979_v38 = vpack.c.bf16 %v472_v32, %v471_v31  ;;  %v455_v39 = vld [vmem:[#allocation7 + $0x140] sm:$0xff]  ;;  %v442_v42 = vld [vmem:[#allocation7 + $0xd8] sm:$0xff]  ;;  %v251_v19 = vsub.s32 0, %v250_v18  ;;  %v259_v20 = vsub.s32 2, %v250_v18  ;;  %v263_v23 = vsub.s32 3, %v250_v18 }
  0x7e   :  { %964 = vmatprep.subr.bf16.mxu0 %v963_v45  ;;  %v456_v40 = vld [vmem:[#allocation7 + $0x148] sm:$0xff]  ;;  %v473_v43 = vld [vmem:[#allocation7 + $0x1d0] sm:$0xff]  ;;  %v474_v44 = vld [vmem:[#allocation7 + $0x1d8] sm:$0xff]  ;;  %v949_v45 = vpack.c.bf16 %v424_v36, %v423_v35  ;;  %v951_v49 = vpack.c.bf16 %v442_v42, %v441_v41 }
  0x7f   :  { %v425_v47 = vld [vmem:[#allocation7 + $0x50] sm:$0xff]  ;;  %v426_v48 = vld [vmem:[#allocation7 + $0x58] sm:$0xff]  ;;  %v983_v50 = vpack.c.bf16 %v474_v44, %v473_v43  ;;  %v443_v53 = vld [vmem:[#allocation7 + $0xe0] sm:$0xff] }
  0x80   :  { %v457_v51 = vld [vmem:[#allocation7 + $0x150] sm:$0xff]  ;;  %v444_v54 = vld [vmem:[#allocation7 + $0xe8] sm:$0xff]  ;;  %v475_v55 = vld [vmem:[#allocation7 + $0x1e0] sm:$0xff] }
  0x81   :  { %v427_v61 = vld [vmem:[#allocation7 + $0x60] sm:$0xff]  ;;  %v460_v3 = vld [vmem:[#allocation7 + $0x168] sm:$0xff]  ;;  %v445_v5 = vld [vmem:[#allocation7 + $0xf0] sm:$0xff] }
  0x82   :  { %v446_v6 = vld [vmem:[#allocation7 + $0xf8] sm:$0xff]  ;;  %v477_v7 = vld [vmem:[#allocation7 + $0x1f0] sm:$0xff]  ;;  %v628_v35 = vld [vmem:[#allocation9 + $0x8] sm:$0xff] }
  0x83   :  { %v959_v8 = vpack.c.bf16 %v446_v6, %v445_v5  ;;  %v430_v11 = vld [vmem:[#allocation7 + $0x78] sm:$0xff]  ;;  %v629_v43 = vld [vmem:[#allocation9 + $0x10] sm:$0xff] }
  0x84   :  { %v462_v15 = vld [vmem:[#allocation7 + $0x178] sm:$0xff] }
  0x85   :  { %v630_v44 = vld [vmem:[#allocation9 + $0x18] sm:$0xff] }
 0x133   :  { %v178_v52 = vpop.f32.mrb[0].mxu0 }
 0x134   :  { %v179_v56 = vadd.f32 %v728_v46, %v178_v52  ;;  %v828_v57 = vpop.f32.mrb[1].mxu0  ;;  %v981_v46 = vpack.c.bf16 %v456_v40, %v455_v39  ;;  %v458_v52 = vld [vmem:[#allocation7 + $0x158] sm:$0xff] }
 0x135   :  { %v953_v57 = vpack.c.bf16 %v426_v48, %v425_v47  ;;  %v632_v47 = vld [vmem:[#allocation9 + $0x28] sm:$0xff] }
 0x136   :  { %v182_v62 = vmax.f32 %v179_v56, 0.0  ;;  %v476_v56 = vld [vmem:[#allocation7 + $0x1e8] sm:$0xff] }
 0x137   :  { %v987_v60 = vpack.c.bf16 %v476_v56, %v475_v55  ;;  %v638_v55 = vld [vmem:[#allocation9 + $0x58] sm:$0xff] }
 0x138   :  { %334 = vmatmul.mubr.f32.vlgmr.msra.gmra.mrb[0].mxu1 %v182_v62  ;;  %405 = vmatmul.mubr.f32.vlgmr.msra.gmra.mrb[2].mxu0 %v182_v62  ;;  %v428_v62 = vld [vmem:[#allocation7 + $0x68] sm:$0xff] }
 0x139   :  { %934 = vmatpush3.bf16.msra.mxu1 %v933_v58  ;;  %966 = vmatpush3.bf16.msra.mxu0 %v965_v59  ;;  %v985_v58 = vpack.c.bf16 %v458_v52, %v457_v51  ;;  %v955_v59 = vpack.c.bf16 %v444_v54, %v443_v53  ;;  %v635_v52 = vld [vmem:[#allocation9 + $0x40] sm:$0xff]  ;;  %v636_v53 = vld [vmem:[#allocation9 + $0x48] sm:$0xff] }
 0x13a   :  { %936 = vmatprep.subr.bf16.mxu1 %v935_v63  ;;  %968 = vmatprep.subr.bf16.mxu0 %v967_v2  ;;  %v459_v63 = vld [vmem:[#allocation7 + $0x160] sm:$0xff]  ;;  %v957_v2 = vpack.c.bf16 %v428_v62, %v427_v61  ;;  %v1008_v54 = vpack.c.bf16 %v636_v53, %v635_v52  ;;  %v642_v61 = vld [vmem:[#allocation9 + $0x78] sm:$0xff] }
 0x13b   :  { %v989_v4 = vpack.c.bf16 %v460_v3, %v459_v63  ;;  %v730_v3 = vld [vmem:[%s1315_s6] ss:$0 sm:$0xff] }
 0x13d   :  { %938 = vmatpush3.bf16.msra.mxu1 %v937_v9  ;;  %970 = vmatpush3.bf16.msra.mxu0 %v969_v10  ;;  %v478_v9 = vld [vmem:[#allocation7 + $0x1f8] sm:$0xff]  ;;  %v429_v10 = vld [vmem:[#allocation7 + $0x70] sm:$0xff] }
 0x13e   :  { %940 = vmatprep.subr.bf16.mxu1 %v939_v13  ;;  %972 = vmatprep.subr.bf16.mxu0 %v971_v14  ;;  %v991_v12 = vpack.c.bf16 %v478_v9, %v477_v7  ;;  %v961_v13 = vpack.c.bf16 %v430_v11, %v429_v10  ;;  %v461_v14 = vld [vmem:[#allocation7 + $0x170] sm:$0xff] }
 0x13f   :  { %v993_v16 = vpack.c.bf16 %v462_v15, %v461_v14 }
 0x141   :  { %942 = vmatpush3.bf16.msra.mxu1 %v941_v21  ;;  %974 = vmatpush3.bf16.msra.mxu0 %v973_v22  ;;  %v247_v21 = vld [vmem:[%s1313_s4] sm:$0xf]  ;;  %v255_v22 = vsub.s32 1, %v250_v18 }
 0x142   :  { %944 = vmatprep.subr.bf16.mxu1 %v943_v25  ;;  %976 = vmatprep.subr.bf16.mxu0 %v975_v26  ;;  %v252_v24 = vrot.slane %v247_v21, %v251_v19  ;;  %v260_v25 = vrot.slane %v247_v21, %v259_v20  ;;  %v264_v27 = vrot.slane %v247_v21, %v263_v23 }
 0x143   :  { %v256_v26 = vrot.slane %v247_v21, %v255_v22 }
 0x145   :  { %946 = vmatpush3.bf16.msra.mxu1 %v945_v33  ;;  %978 = vmatpush3.bf16.msra.mxu0 %v977_v34  ;;  %v627_v34 = vld [vmem:[#allocation9] sm:$0xff] }
 0x146   :  { %948 = vmatprep.subr.bf16.mxu1 %v947_v37  ;;  %980 = vmatprep.subr.bf16.mxu0 %v979_v38  ;;  %v996_v40 = vpack.c.bf16 %v628_v35, %v627_v34 }
 0x149   :  { %950 = vmatpush3.bf16.msra.mxu1 %v949_v45  ;;  %982 = vmatpush3.bf16.msra.mxu0 %v981_v46  ;;  %v999_v45 = vpack.c.bf16 %v630_v44, %v629_v43  ;;  %v631_v46 = vld [vmem:[#allocation9 + $0x20] sm:$0xff] }
 0x14a   :  { %952 = vmatprep.subr.bf16.mxu1 %v951_v49  ;;  %984 = vmatprep.subr.bf16.mxu0 %v983_v50  ;;  %v1002_v48 = vpack.c.bf16 %v632_v47, %v631_v46  ;;  %v633_v49 = vld [vmem:[#allocation9 + $0x30] sm:$0xff]  ;;  %v634_v50 = vld [vmem:[#allocation9 + $0x38] sm:$0xff] }
 0x14b   :  { %v1005_v51 = vpack.c.bf16 %v634_v50, %v633_v49 }
 0x14d   :  { %954 = vmatpush3.bf16.msra.mxu1 %v953_v57  ;;  %986 = vmatpush3.bf16.msra.mxu0 %v985_v58  ;;  %v639_v57 = vld [vmem:[#allocation9 + $0x60] sm:$0xff]  ;;  %v640_v58 = vld [vmem:[#allocation9 + $0x68] sm:$0xff] }
 0x14e   :  { %956 = vmatprep.subr.bf16.mxu1 %v955_v59  ;;  %988 = vmatprep.subr.bf16.mxu0 %v987_v60  ;;  %v1014_v59 = vpack.c.bf16 %v640_v58, %v639_v57  ;;  %v641_v60 = vld [vmem:[#allocation9 + $0x70] sm:$0xff] }
 0x14f   :  { %v1017_v62 = vpack.c.bf16 %v642_v61, %v641_v60 }
 0x151   :  { %958 = vmatpush3.bf16.msra.mxu1 %v957_v2  ;;  %990 = vmatpush3.bf16.msra.mxu0 %v989_v4 }
 0x152   :  { %960 = vmatprep.subr.bf16.mxu1 %v959_v8  ;;  %992 = vmatprep.subr.bf16.mxu0 %v991_v12 }
 0x155   :  { %962 = vmatpush3.bf16.msra.mxu1 %v961_v13  ;;  %994 = vmatpush3.bf16.msra.mxu0 %v993_v16 }
 0x156   :  { %995 = vmatprep.subr.bf16.mxu1 %v1156_v0 }
 0x20b   :  { %v335_v28 = vpop.f32.mrb[0].mxu1  ;;  %v406_v29 = vpop.f32.mrb[2].mxu0 }
 0x20c   :  { %v336_v30 = vadd.f32 %v335_v28, %v252_v24  ;;  %v407_v31 = vadd.f32 %v406_v29, %v260_v25  ;;  %v337_v32 = vpop.f32.mrb[1].mxu1  ;;  %v408_v33 = vpop.f32.mrb[3].mxu0 }
 0x20d   :  { %v338_v36 = vadd.f32 %v337_v32, %v256_v26  ;;  %v409_v37 = vadd.f32 %v408_v33, %v264_v27 }
 0x20e   :  { %v411_v41 = vmax.f32 %v336_v30, 0.0  ;;  %v413_v42 = vmax.f32 %v407_v31, 0.0 }
 0x20f   :  { %v412_v38 = vmax.f32 %v338_v36, 0.0  ;;  %v414_v39 = vmax.f32 %v409_v37, 0.0 }
 0x211   :  { %550 = vmatprep.mubr.f32.mxu1 %v412_v38  ;;  %620 = vmatprep.mubr.f32.mxu0 %v414_v39 }
 0x212   :  { %551 = vmatmul.mubr.f32.vlgmr.msra.gmra.mrb[2].mxu1 %v411_v41  ;;  %621 = vmatmul.mubr.f32.vlgmr.msra.gmra.mrb[4].mxu0 %v413_v42 }
 0x213   :  { %997 = vmatpush3.bf16.msra.mxu1 %v996_v40  ;;  %861 = vmatprep.mubr.msk.f32.mxu1 %vm1157_vm0, %v1158_v1  ;;  %v637_v1 = vld [vmem:[#allocation9 + $0x50] sm:$0xff] }
 0x214   :  { %998 = vmatprep.subr.bf16.mxu1 %v1156_v0  ;;  %v1011_v56 = vpack.c.bf16 %v638_v55, %v637_v1 }
 0x217   :  { %1000 = vmatpush3.bf16.msra.mxu1 %v999_v45 }
 0x218   :  { %1001 = vmatprep.subr.bf16.mxu1 %v1156_v0 }
 0x21b   :  { %1003 = vmatpush3.bf16.msra.mxu1 %v1002_v48 }
 0x21c   :  { %1004 = vmatprep.subr.bf16.mxu1 %v1156_v0 }
 0x21f   :  { %1006 = vmatpush3.bf16.msra.mxu1 %v1005_v51 }
 0x220   :  { %1007 = vmatprep.subr.bf16.mxu1 %v1156_v0 }
 0x223   :  { %1009 = vmatpush3.bf16.msra.mxu1 %v1008_v54 }
 0x224   :  { %1010 = vmatprep.subr.bf16.mxu1 %v1156_v0 }
 0x227   :  { %1012 = vmatpush3.bf16.msra.mxu1 %v1011_v56 }
 0x228   :  { %1013 = vmatprep.subr.bf16.mxu1 %v1156_v0 }
 0x22b   :  { %1015 = vmatpush3.bf16.msra.mxu1 %v1014_v59 }
 0x22c   :  { %1016 = vmatprep.subr.bf16.mxu1 %v1156_v0  ;;  %v731_v0 = vld [vmem:[%s1317_s8] ss:$0 sm:$0xff] }
 0x22f   :  { %1018 = vmatpush3.bf16.msra.mxu1 %v1017_v62 }
 0x2e5   :  { %v767_v63 = vpop.f32.mrb[2].mxu1  ;;  %v802_v2 = vpop.f32.mrb[4].mxu0 }
 0x2e6   :  { %v768_v4 = vpop.f32.mrb[3].mxu1  ;;  %v803_v5 = vpop.f32.mrb[5].mxu0 }
 0x2e7   :  { %v769_v6 = vadd.f32 %v768_v4, %v767_v63  ;;  %v804_v7 = vadd.f32 %v803_v5, %v802_v2 }
 0x2e9   :  { %v553_v8 = vadd.f32 %v769_v6, %v730_v3 }
 0x2eb   :  { %v623_v9 = vadd.f32 %v804_v7, %v553_v8 }
 0x2ed   :  { %v626_v10 = vmax.f32 %v623_v9, 0.0 }
 0x2ef   :  { %862 = vmatmul.mubr.f32.vlgmr.msra.gmra.mrb[4].mxu1 %v626_v10 }
 0x3c2   :  { %v716_v11 = vpop.f32.mrb[4].mxu1 }
 0x3c3   :  { %v717_v12 = vadd.f32 %v731_v0, %v716_v11  ;;  %v863_v13 = vpop.f32.mrb[5].mxu1 }
 0x3c5   :  { %720 = vst [vmem:[%s1318_s9] sm:$0xff] %v717_v12 }
 0x3c6   :  { %725 = vsyncpa [#allocation3], 1 }
 0x3c7   :  { %726 = vsyncpa [#allocation5], 1 }
 0x3c8   :  { %727 = vsyncpa [#allocation8], 1 }

</bundles_post_ra>
